<compile_context>
chip_gen: v7x
topology: tpu7x:2x2x1
jax: 0.10.0
libtpu: 0.0.40
codegen_flags: <defaults>
</compile_context>

<pallas_src>
import jax
import jax.numpy as jnp
from jax.experimental import pallas as pl
from jax.experimental.pallas import tpu as pltpu


# ------------------------------ small helpers ------------------------------ #

def _round_up(x, m):
    return ((x + m - 1) // m) * m


def _pad_last(a, n):
    pad = n - a.shape[-1]
    if pad:
        a = jnp.pad(a, [(0, 0)] * (a.ndim - 1) + [(0, pad)])
    return a


_VMEM_LIMIT = None


def _vmem_limit_bytes():
    """Generation-aware VMEM request (leave headroom for Mosaic scratch)."""
    global _VMEM_LIMIT
    if _VMEM_LIMIT is None:
        try:
            cap = int(pltpu.get_tpu_info().vmem_capacity_bytes)
        except Exception:
            cap = 128 * 1024 * 1024
        _VMEM_LIMIT = max(16 * 1024 * 1024,
                          min(cap * 3 // 4, 100 * 1024 * 1024))
    return _VMEM_LIMIT


_BUF1_OK = None


def _buffered1_ok():
    """Probe once whether pipeline_mode=pl.Buffered(1) works on this jax."""
    global _BUF1_OK
    if _BUF1_OK is None:
        try:
            def _probe(x_ref, o_ref):
                o_ref[...] = x_ref[...] * 2.0

            x = jnp.arange(8 * 128, dtype=jnp.float32).reshape(8, 128)
            y = pl.pallas_call(
                _probe,
                out_shape=jax.ShapeDtypeStruct((16, 128), jnp.float32),
                grid=(2,),
                in_specs=[pl.BlockSpec((8, 128), lambda i: (0, 0),
                                       pipeline_mode=pl.Buffered(1))],
                out_specs=pl.BlockSpec((8, 128), lambda i: (i, 0)),
            )(x)
            _BUF1_OK = bool(jnp.allclose(y[:8], 2.0 * x)
                            and jnp.allclose(y[8:], 2.0 * x))
        except Exception:
            _BUF1_OK = False
    return _BUF1_OK


def _const_spec(shape, index_map):
    """BlockSpec for an operand whose block never changes across the grid.

    Single-buffered when supported -> no wasted second VMEM copy of weights.
    """
    if _buffered1_ok():
        return pl.BlockSpec(shape, index_map, pipeline_mode=pl.Buffered(1))
    return pl.BlockSpec(shape, index_map)


def _pick_tm(m, cap=512):
    """M tile for the matmul path: >=2 grid blocks (megacore), 256/16-aligned."""
    if m <= 16:
        return _round_up(max(m, 8), 8)
    tm = min(cap, pl.cdiv(m, 2))
    if tm >= 256:
        tm = (tm // 256) * 256      # full-height MXU passes on v6e/v7x
    else:
        tm = _round_up(tm, 16)      # bf16 packs 16 rows per sublane pair
    return max(16, tm)


def _pick_th(ho, wo, n_batch, target=512):
    """Row-band height for the direct-conv kernel (th*wo rows per MXU pass)."""
    th = max(1, min(ho, max(1, target // max(wo, 1))))
    if n_batch * pl.cdiv(ho, th) < 2 and ho >= 2:
        th = pl.cdiv(ho, 2)         # keep both v7x TensorCores busy
    return th


# ------------------------------ Pallas kernels ------------------------------ #

def _matmul_bn_relu_kernel(p_ref, w_ref, b_ref, o_ref):
    """out = relu(patches @ w_folded + bias)   (stride-2 conv1 + bn1 + relu)."""
    acc = jnp.dot(p_ref[...], w_ref[...], preferred_element_type=jnp.float32)
    o_ref[...] = jnp.maximum(acc + b_ref[...], 0.0).astype(o_ref.dtype)


def _make_direct_conv_kernel(th, wo, cin, npad, resid_mode):
    """3x3 / stride-1 conv over a halo-padded image resident in VMEM.

    resid_mode: "none" | "add" (f32 identity skip) | "project" (1x1 matmul).
    """

    def kernel(*refs):
        if resid_mode == "none":
            x_ref, w_ref, b_ref, o_ref = refs
        elif resid_mode == "add":
            x_ref, w_ref, b_ref, r_ref, o_ref = refs
        else:  # "project"
            x_ref, w_ref, b_ref, r_ref, wd_ref, o_ref = refs

        r0 = pl.multiple_of(pl.program_id(1) * th, th)
        acc = jnp.zeros((th * wo, npad), jnp.float32)
        for ky in range(3):
            for kx in range(3):
                xin = x_ref[:, pl.ds(r0 + ky, th), pl.ds(kx, wo), :]
                acc = acc + jnp.dot(xin.reshape(th * wo, cin),
                                    w_ref[ky * 3 + kx],
                                    preferred_element_type=jnp.float32)
        acc = acc + b_ref[...]
        if resid_mode == "add":
            acc = acc + r_ref[...].reshape(th * wo, npad).astype(jnp.float32)
        elif resid_mode == "project":
            cr = r_ref.shape[-1]
            acc = acc + jnp.dot(r_ref[...].reshape(th * wo, cr), wd_ref[...],
                                preferred_element_type=jnp.float32)
        out = jnp.maximum(acc, 0.0).reshape(1, th, wo, npad)
        o_ref[...] = out.astype(o_ref.dtype)

    return kernel


# -------------------------------- wrappers ---------------------------------- #

def conv_bn_relu_matmul(patches, w, bias, *, out_dtype, tm):
    """Fused (M,K)@(K,Npad) + folded-BN bias + ReLU (im2col path)."""
    m, k = patches.shape
    npad = w.shape[1]
    return pl.pallas_call(
        _matmul_bn_relu_kernel,
        out_shape=jax.ShapeDtypeStruct((m, npad), out_dtype),
        grid=(pl.cdiv(m, tm),),
        in_specs=[
            pl.BlockSpec((tm, k), lambda i: (i, 0)),       # bf16 patch tile
            _const_spec((k, npad), lambda i: (0, 0)),      # folded weight
            _const_spec((1, npad), lambda i: (0, 0)),      # folded BN bias
        ],
        out_specs=pl.BlockSpec((tm, npad), lambda i: (i, 0)),
        compiler_params=pltpu.CompilerParams(
            dimension_semantics=("parallel",),
            vmem_limit_bytes=_vmem_limit_bytes()),
    )(patches, w, bias)


def direct_conv3x3(x_nhwc, w9, bias, *, th, out_dtype,
                   resid_mode="none", resid=None, wd=None):
    """3x3 / stride-1 conv + folded-BN bias (+ optional skip) + ReLU, no im2col."""
    n, ho, wo, cin = x_nhwc.shape
    npad = w9.shape[-1]
    n_i = pl.cdiv(ho, th)
    # 1-pixel halo, plus extra zero rows so a partial last row-block still
    # reads in-bounds from the VMEM-resident image.
    pad_extra = n_i * th - ho
    xp = jnp.pad(x_nhwc, ((0, 0), (1, 1 + pad_extra), (1, 1), (0, 0)))
    hp, wp = xp.shape[1], xp.shape[2]

    kernel = _make_direct_conv_kernel(th, wo, cin, npad, resid_mode)

    in_specs = [
        pl.BlockSpec((1, hp, wp, cin), lambda b, i: (b, 0, 0, 0)),  # whole image
        _const_spec((9, cin, npad), lambda b, i: (0, 0, 0)),        # folded w
        _const_spec((1, npad), lambda b, i: (0, 0)),                # folded bias
    ]
    args = [xp, w9, bias]
    if resid_mode == "add":
        in_specs.append(pl.BlockSpec((1, th, wo, npad),
                                     lambda b, i: (b, i, 0, 0)))    # f32 skip
        args.append(resid)
    elif resid_mode == "project":
        cr = resid.shape[-1]
        in_specs.append(pl.BlockSpec((1, th, wo, cr),
                                     lambda b, i: (b, i, 0, 0)))    # bf16 rows
        in_specs.append(_const_spec((cr, npad), lambda b, i: (0, 0)))
        args += [resid, wd]

    return pl.pallas_call(
        kernel,
        out_shape=jax.ShapeDtypeStruct((n, ho, wo, npad), out_dtype),
        grid=(n, n_i),
        in_specs=in_specs,
        out_specs=pl.BlockSpec((1, th, wo, npad), lambda b, i: (b, i, 0, 0)),
        compiler_params=pltpu.CompilerParams(
            dimension_semantics=("parallel", "parallel"),
            vmem_limit_bytes=_vmem_limit_bytes()),
    )(*args)


# --------------------------------- glue ------------------------------------- #

def im2col_3x3(x_nhwc, stride):
    """3x3, pad=1 patch extraction.  Only used for the stride-2 conv1."""
    n, h, w, c = x_nhwc.shape
    xp = jnp.pad(x_nhwc, ((0, 0), (1, 1), (1, 1), (0, 0)))
    ho = (h + 2 - 3) // stride + 1
    wo = (w + 2 - 3) // stride + 1
    taps = []
    for ky in range(3):
        for kx in range(3):
            taps.append(xp[:, ky:ky + (ho - 1) * stride + 1:stride,
                           kx:kx + (wo - 1) * stride + 1:stride, :])
    patches = jnp.concatenate(taps, axis=-1)
    return patches.reshape(n * ho * wo, 9 * c), (n, ho, wo)


def fold_bn(gamma, beta, mean, var, eps=1e-5):
    scale = gamma / jnp.sqrt(var + eps)
    bias = beta - mean * scale
    return scale, bias


def _fold_w3x3(w_oihw, scale, npad):
    """OIHW 3x3 weight -> (9, Cin, Npad) bf16 with BN scale folded in."""
    cout, cin = w_oihw.shape[0], w_oihw.shape[1]
    w9 = jnp.transpose(w_oihw, (2, 3, 1, 0)).reshape(9, cin, cout)
    return _pad_last(w9 * scale[None, None, :], npad).astype(jnp.bfloat16)


def basic_block_forward(x_nchw, params, stride, *, out_dtype=jnp.float32):
    """Pallas implementation of BasicBlock.forward (with_dcn=False)."""
    cout, cin = params["w1"].shape[0], params["w1"].shape[1]
    npad = _round_up(cout, 128)

    s1, b1 = fold_bn(*params["bn1"])
    s2, b2 = fold_bn(*params["bn2"])

    # conv2 weight: (9, Npad, Npad) -- input channels padded because the conv1
    # intermediate keeps Npad channels (its padded channels are exactly 0).
    w2_9 = _fold_w3x3(params["w2"], s2, npad)
    w2_9 = jnp.pad(w2_9, ((0, 0), (0, npad - cout), (0, 0)))

    if stride > 1:
        # ---- conv1: 3x3 / stride, via im2col + MXU matmul ----
        x_bf = jnp.transpose(x_nchw.astype(jnp.bfloat16), (0, 2, 3, 1))
        w1m = jnp.transpose(params["w1"], (2, 3, 1, 0)).reshape(9 * cin, cout)
        w1p = _pad_last(w1m * s1[None, :], npad).astype(jnp.bfloat16)
        b1p = _pad_last(b1[None, :], npad)
        p1, (n, ho, wo) = im2col_3x3(x_bf, stride)
        out1_nhwc = conv_bn_relu_matmul(
            p1, w1p, b1p, out_dtype=jnp.bfloat16,
            tm=_pick_tm(p1.shape[0])).reshape(n, ho, wo, npad)

        # ---- skip: 1x1 / stride projection + bn, folded, fused into conv2 ----
        sd, bd = fold_bn(*params["bnd"])
        wdm = jnp.transpose(params["wd"], (2, 3, 1, 0)).reshape(cin, cout)
        wdp = _pad_last(wdm * sd[None, :], npad).astype(jnp.bfloat16)
        resid = x_bf[:, ::stride, ::stride, :]            # (n, ho, wo, cin)
        bias2 = _pad_last((b2 + bd)[None, :], npad)
        resid_mode, wd_arg = "project", wdp
    else:
        # identity skip (mirrors PyTorch: no projection => Cin must equal Cout)
        assert cin == cout, "stride == 1 requires in_channel == out_channel"
        x_res = jnp.transpose(x_nchw, (0, 2, 3, 1))       # f32 NHWC (skip path)
        x_bf = x_res.astype(jnp.bfloat16)
        n, ho, wo = x_res.shape[0], x_res.shape[1], x_res.shape[2]

        # ---- conv1: 3x3 / stride 1, direct conv (no im2col) ----
        w1_9 = _fold_w3x3(params["w1"], s1, npad)
        b1p = _pad_last(b1[None, :], npad)
        out1_nhwc = direct_conv3x3(x_bf, w1_9, b1p, th=_pick_th(ho, wo, n),
                                   out_dtype=jnp.bfloat16, resid_mode="none")

        resid = _pad_last(x_res, npad)                    # f32 identity skip
        bias2 = _pad_last(b2[None, :], npad)
        resid_mode, wd_arg = "add", None

    # ---- conv2: 3x3 / stride 1, direct conv + bn2 + skip + relu, fused ----
    out2 = direct_conv3x3(out1_nhwc, w2_9, bias2, th=_pick_th(ho, wo, n),
                          out_dtype=out_dtype, resid_mode=resid_mode,
                          resid=resid, wd=wd_arg)

    out_nhwc = out2[..., :cout]
    return jnp.transpose(out_nhwc, (0, 3, 1, 2))          # NCHW


# -------------------------------- reference --------------------------------- #

def ref_forward(x_nchw, params, stride):
    """Pure f32 lax.conv reference of the PyTorch module (inference BN)."""
    def conv(x, w, s, pad):
        return jax.lax.conv_general_dilated(
            x, w, (s, s), ((pad, pad), (pad, pad)),
            dimension_numbers=("NCHW", "OIHW", "NCHW"))

    def bn(x, p):
        g, b, m, v = p
        sc = g / jnp.sqrt(v + 1e-5)
        return x * sc[None, :, None, None] + (b - m * sc)[None, :, None, None]

    out = jax.nn.relu(bn(conv(x_nchw, params["w1"], stride, 1), params["bn1"]))
    out = bn(conv(out, params["w2"], 1, 1), params["bn2"])
    ident = x_nchw
    if stride > 1:
        ident = bn(conv(x_nchw, params["wd"], stride, 0), params["bnd"])
    return jax.nn.relu(out + ident)


# ---------------------------------- main ------------------------------------ #

def _make_bn(keys, c):
    return (1.0 + 0.1 * jax.random.normal(keys[0], (c,), jnp.float32),   # gamma
            0.1 * jax.random.normal(keys[1], (c,), jnp.float32),          # beta
            0.1 * jax.random.normal(keys[2], (c,), jnp.float32),          # mean
            jnp.abs(jax.random.normal(keys[3], (c,), jnp.float32)) + 0.5) # var


def _make_params(key, cin, cout, with_downsample):
    ks = jax.random.split(key, 16)
    p = {
        "w1": 0.1 * jax.random.normal(ks[1], (cout, cin, 3, 3), jnp.float32),
        "w2": 0.1 * jax.random.normal(ks[2], (cout, cout, 3, 3), jnp.float32),
        "bn1": _make_bn(ks[4:8], cout),
        "bn2": _make_bn(ks[8:12], cout),
    }
    if with_downsample:
        p["wd"] = 0.1 * jax.random.normal(ks[3], (cout, cin, 1, 1), jnp.float32)
        p["bnd"] = _make_bn(ks[12:16], cout)
    return p


if __name__ == "__main__":
    key = jax.random.PRNGKey(0)
    k_x2, k_p2, k_x1, k_p1 = jax.random.split(key, 4)

    # --- down-sampling block: stride 2, Cin 4 -> Cout 8 (projection skip) ---
    x2 = jax.random.normal(k_x2, (2, 4, 16, 16), jnp.float32)
    p2 = _make_params(k_p2, 4, 8, with_downsample=True)
    out2 = jax.block_until_ready(basic_block_forward(x2, p2, stride=2))
    ref2 = jax.block_until_ready(ref_forward(x2, p2, stride=2))
    assert out2.shape == (2, 8, 8, 8), out2.shape
    err2 = float(jnp.max(jnp.abs(out2 - ref2)))
    assert jnp.allclose(out2, ref2, rtol=5e-2, atol=5e-2), err2

    # --- identity block: stride 1, Cin == Cout == 8 (f32 identity skip) ---
    x1 = jax.random.normal(k_x1, (2, 8, 16, 16), jnp.float32)
    p1 = _make_params(k_p1, 8, 8, with_downsample=False)
    out1 = jax.block_until_ready(basic_block_forward(x1, p1, stride=1))
    ref1 = jax.block_until_ready(ref_forward(x1, p1, stride=1))
    assert out1.shape == (2, 8, 16, 16), out1.shape
    err1 = float(jnp.max(jnp.abs(out1 - ref1)))
    assert jnp.allclose(out1, ref1, rtol=5e-2, atol=5e-2), err1

    print("KERNEL_OK")
</pallas_src>

<mosaic_0001>
module attributes {stable_mosaic.version = 11 : i64} {
  func.func @_probe(%arg0: i32, %arg1: memref<8x128xf32, #tpu.memory_space<vmem>>, %arg2: memref<8x128xf32, #tpu.memory_space<vmem>>) attributes {dimension_semantics = [#tpu.dimension_semantics<arbitrary>], iteration_bounds = array<i64: 2>, scalar_prefetch = 0 : i64, scratch_operands = 0 : i64, tpu.core_type = #tpu.core_type<tc>, window_params = [{pipeline_mode = #tpu.pipeline_mode<synchronous>, transform_indices = @transform_0, window_bounds = array<i64: 8, 128>}, {transform_indices = @transform_1, window_bounds = array<i64: 8, 128>}]} {
    %c0 = arith.constant 0 : index
    %c0_0 = arith.constant 0 : index
    %0 = vector.load %arg1[%c0, %c0_0] : memref<8x128xf32, #tpu.memory_space<vmem>>, vector<8x128xf32>
    %cst = arith.constant 2.000000e+00 : f32
    %1 = vector.broadcast %cst : f32 to vector<8x128xf32>
    %2 = arith.mulf %0, %1 : vector<8x128xf32>
    %c0_1 = arith.constant 0 : index
    %c0_2 = arith.constant 0 : index
    %3 = vector.load %arg2[%c0_1, %c0_2] : memref<8x128xf32, #tpu.memory_space<vmem>>, vector<8x128xf32>
    tpu.vector_store %arg2[%c0_1, %c0_2], %2 {strides = array<i32>} : memref<8x128xf32, #tpu.memory_space<vmem>>, vector<8x128xf32>,
    return
  }
  func.func @transform_0(%arg0: i32) -> (i32, i32) {
    %c0_i32 = arith.constant 0 : i32
    %c0_i32_0 = arith.constant 0 : i32
    %c0_i32_1 = arith.constant 0 : i32
    return %c0_i32, %c0_i32_0 : i32, i32
  }
  func.func @transform_1(%arg0: i32) -> (i32, i32) {
    %c0_i32 = arith.constant 0 : i32
    %c0_i32_0 = arith.constant 0 : i32
    return %arg0, %c0_i32 : i32, i32
  }
}

module attributes {stable_mosaic.version = 11 : i64} {
  func.func @_matmul_bn_relu_kernel(%arg0: i32, %arg1: memref<64x36xbf16, #tpu.memory_space<vmem>>, %arg2: memref<36x128xbf16, #tpu.memory_space<vmem>>, %arg3: memref<1x128xf32, #tpu.memory_space<vmem>>, %arg4: memref<64x128xbf16, #tpu.memory_space<vmem>>) attributes {dimension_semantics = [#tpu.dimension_semantics<parallel>], iteration_bounds = array<i64: 2>, scalar_prefetch = 0 : i64, scratch_operands = 0 : i64, tpu.core_type = #tpu.core_type<tc>, window_params = [{transform_indices = @transform_0, window_bounds = array<i64: 64, 36>}, {pipeline_mode = #tpu.pipeline_mode<synchronous>, transform_indices = @transform_1, window_bounds = array<i64: 36, 128>}, {pipeline_mode = #tpu.pipeline_mode<synchronous>, transform_indices = @transform_2, window_bounds = array<i64: 1, 128>}, {transform_indices = @transform_3, window_bounds = array<i64: 64, 128>}]} {
    %c0 = arith.constant 0 : index
    %c0_0 = arith.constant 0 : index
    %0 = vector.load %arg1[%c0, %c0_0] : memref<64x36xbf16, #tpu.memory_space<vmem>>, vector<64x36xbf16>
    %c0_1 = arith.constant 0 : index
    %c0_2 = arith.constant 0 : index
    %1 = vector.load %arg2[%c0_1, %c0_2] : memref<36x128xbf16, #tpu.memory_space<vmem>>, vector<36x128xbf16>
    %cst = arith.constant dense<0.000000e+00> : vector<64x128xf32>
    %2 = tpu.matmul %0, %1, %cst {dimension_numbers = #tpu.dot_dimension_numbers<[1], [0], [0], [1], [0, 0, 1, 1], [], []>} : vector<64x36xbf16>, vector<36x128xbf16>, vector<64x128xf32> -> vector<64x128xf32>
    %c0_3 = arith.constant 0 : index
    %c0_4 = arith.constant 0 : index
    %3 = vector.load %arg3[%c0_3, %c0_4] : memref<1x128xf32, #tpu.memory_space<vmem>>, vector<1x128xf32>
    %4 = vector.broadcast %3 : vector<1x128xf32> to vector<64x128xf32>
    %5 = arith.addf %2, %4 : vector<64x128xf32>
    %cst_5 = arith.constant 0.000000e+00 : f32
    %6 = vector.broadcast %cst_5 : f32 to vector<64x128xf32>
    %7 = arith.maximumf %5, %6 : vector<64x128xf32>
    %8 = arith.truncf %7 : vector<64x128xf32> to vector<64x128xbf16>
    %c0_6 = arith.constant 0 : index
    %c0_7 = arith.constant 0 : index
    %9 = vector.load %arg4[%c0_6, %c0_7] : memref<64x128xbf16, #tpu.memory_space<vmem>>, vector<64x128xbf16>
    tpu.vector_store %arg4[%c0_6, %c0_7], %8 {strides = array<i32>} : memref<64x128xbf16, #tpu.memory_space<vmem>>, vector<64x128xbf16>,
    return
  }
  func.func @transform_0(%arg0: i32) -> (i32, i32) {
    %c0_i32 = arith.constant 0 : i32
    %c0_i32_0 = arith.constant 0 : i32
    return %arg0, %c0_i32 : i32, i32
  }
  func.func @transform_1(%arg0: i32) -> (i32, i32) {
    %c0_i32 = arith.constant 0 : i32
    %c0_i32_0 = arith.constant 0 : i32
    %c0_i32_1 = arith.constant 0 : i32
    return %c0_i32, %c0_i32_0 : i32, i32
  }
  func.func @transform_2(%arg0: i32) -> (i32, i32) {
    %c0_i32 = arith.constant 0 : i32
    %c0_i32_0 = arith.constant 0 : i32
    %c0_i32_1 = arith.constant 0 : i32
    return %c0_i32, %c0_i32_0 : i32, i32
  }
  func.func @transform_3(%arg0: i32) -> (i32, i32) {
    %c0_i32 = arith.constant 0 : i32
    %c0_i32_0 = arith.constant 0 : i32
    return %arg0, %c0_i32 : i32, i32
  }
}

</mosaic_0001>

<bundles_post_ra>
// kernel: tpu_custom_call.1
= control target key start
LH: loop header
LB: loop body
LE: loop exit
PB: predicated region body
PF: predicated region fallthrough
CT: control target
= control target key end

     0   :  { %6 = vsyncpa [#allocation3], 0  ;;  %s482_s0 = inlined_call_operand.hbm [shape: f32[8,128], index: 0, kind: input, shape index: {}]   ;;  %s483_s1 = inlined_call_operand.hbm [shape: f32[16,128], index: 1, kind: output, shape index: {}]  }
   0x1   :  { %7 = vsyncpa [#allocation4], 0 }
   0x2   :  { %9 = vsyncpa [#allocation4 + $0x1], 0  ;;  %s352_s6 = smov 0   ;;  %s354_s7 = smov 0  }
   0x3   :  { %s356_s8 = smov 0   ;;  %s358_s9 = smov 0  }
   0x4 LB: > { %s373_s10 = sadd.s32 4294967295, %s338_s9   ;;  %s184_s11 = sadd.s32 4294967294, %s338_s9   ;;  %s338_s9 = sphi %s358_s9, %s499_s9   ;;  %s334_s8 = sphi %s356_s8, %s498_s8   ;;  %s330_s7 = sphi %s354_s7, %s497_s7   ;;  %s326_s6 = sphi %s352_s6, %s496_s6  }
   0x5   : > { %s377_s12 = sadd.s32 1, %s338_s9   ;;  %s43_s13 = sadd.s32 1, %s334_s8 }
   0x6   : > { %s40_s14 = ssub.s32 %s338_s9, %s377_s12  ;;  %p53_p0 = scmp.ne.s32.totalorder %s334_s8, %s330_s7 }
   0x7   : > { %p41_p1 = scmp.eq.s32.totalorder %s40_s14, 0  ;;  %p54_p2 = scmp.eq.s32.totalorder %s373_s10, 1 }
   0x8   : > { %p59_p3 = scmp.ne.s32.totalorder %s330_s7, %s326_s6  ;;  %p60_p4 = scmp.eq.s32.totalorder %s184_s11, 1 }
   0x9   : > { %s388_s15 = scalar_select %p41_p1, %s334_s8, %s43_s13  }
   0xa   : > { %p390_p5 = por %p54_p2, %p53_p0  ;;  %p394_p6 = por %p60_p4, %p59_p3 }
   0xb   : > { %p185_p7 = scmp.ge.s32.totalorder %s338_s9, 1  ;;  %p67_p8 = scmp.lt.s32.totalorder %s338_s9, 3 }
   0xc   : > { %s487_s16 = scalar_select %p390_p5, 1, 0 }
   0xd   : > { %s488_s17 = scalar_select %p394_p6, 1, 0 }
   0xe   : > { %p484_p9 = scmp.eq.s32.totalorder %s373_s10, 0  ;;  %p401_p10 = pnand %p185_p7, %p67_p8 }
   0xf   : > { %s340_s19 = smov [#allocation2]   ;;  %s244_s24 = scalar_lea.hbm %s482_s0, 128 }
  0x10   : > { %s489_s18 = scalar_select %p401_p10, 1, 0 }
  0x11   : > { %s80_s20 = sshll.u32 %s340_s19, 4  ;;  %p200_p11 = pneg %p401_p10  ;;  %s81_s20 = int_to_ptr.vmem [resolvable:$true] %s80_s20 }
  0x12   : > { %p245_p13 = scmp.ne.s32.totalorder %s482_s0, %s244_s24  ;;  %p251_p3 = scmp.lt.u32.totalorder %s244_s24, %s482_s0 }
  0x13   : > { %p409_p12 = pnand %p484_p9, %p200_p11 }
  0x15   : > { %p246_p0 = pneg %p409_p12 }
  0x17   : > { %p247_p1 = pnand %p246_p0, %p245_p13 }
  0x19   : > { %p248_p2 = pneg %p247_p1 }
  0x1b   : > { %p253_p4 = pnand %p251_p3, %p248_p2 }
  0x1d   : > { %256 = shalt.err (!%p253_p4)
}
  0x1e   : > { %s257_s29 = scalar_lea.vmem %s81_s20, 128  ;;  %p265_p9 = scmp.lt.s32.totalorder %s81_s20, %s81_s20 }
  0x1f   : > { %p258_p7 = scmp.ne.s32.totalorder %s81_s20, %s257_s29  ;;  %p266_p6 = scmp.lt.s32.totalorder %s257_s29, %s257_s29 }
  0x21   : > { %p260_p8 = pnand %p258_p7, %p246_p0  ;;  %p267_p5 = por %p266_p6, %p265_p9 }
  0x23   : > { %p261_p11 = pneg %p260_p8 }
  0x25   : > { %p268_p10 = pnand %p267_p5, %p261_p11 }
  0x27   : > { %271 = shalt.err (!%p268_p10)
}
  0x28   : > { %203 = dma.hbm_to_vmem [thread:$0]  (!%p409_p12), %s482_s0, 128, %s81_s20, [#allocation3]  }
  0x29   : > { %p491_p13 = scmp.ne.s32.totalorder %s489_s18, 0 }
  0x2a   : > { %p492_p1 = scmp.eq.s32.totalorder (!%p491_p13), %s373_s10, 0 }
  0x2b   : > { %93 = sbr.rel (%p491_p13) target bundleno = 77 (0x4d), region = 24 }
  0x32   : > { %317 = dma.done.wait (%p492_p1), [#allocation3], 128   ;;  %p493_p0 = pmov %p492_p1 }
  0x33   : > { %s105_s3 = sand.u32 1, %s330_s7   ;;  %s191_s13 = sshll.u32 %s373_s10, 7  ;;  %v108_v0 = vld [vmem:[#allocation2] sm:$0xff] }
  0x34   : > { %319 = vsyncadd (%p493_p0), [#allocation3], 4294967168  ;;  %s189_s4 = sshll.u32 %s105_s3, 3  ;;  %v109_v1 = vmul.f32 2.0, %v108_v0  ;;  %s442_s19 = scalar_lea.hbm %s483_s1, %s191_s13 }
  0x35   : > { %s107_s5 = scalar_lea.vmem [#allocation5], %s189_s4  ;;  %s112_s20 = scalar_lea.sflag [#allocation4], %s105_s3 }
  0x36   : > { %s125_s11 = sshll.u32 %s107_s5, 4  ;;  %110 = vst [vmem:[%s107_s5] sm:$0xff] %v109_v1  ;;  %p494_p6 = scmp.ne.s32.totalorder %s487_s16, 0  ;;  %s437_s11 = int_to_ptr.vmem [resolvable:$true] %s125_s11 }
  0x37   : > { %s272_s21 = scalar_lea.vmem %s437_s11, 128  ;;  %s341_s10 = smov [#allocation5]  }
  0x38   : > { %p273_p5 = scmp.ne.s32.totalorder %s437_s11, %s272_s21  ;;  %s276_s22 = sshll.u32 %s341_s10, 4  ;;  %s277_s22 = int_to_ptr.vmem [resolvable:$false] %s276_s22 }
  0x39   : > { %s278_s23 = scalar_lea.vmem %s277_s22, 256  ;;  %p279_p12 = scmp.lt.s32.totalorder %s437_s11, %s277_s22 }
  0x3a   : > { %p274_p9 = pnand %p273_p5, %p494_p6  ;;  %p280_p2 = scmp.lt.s32.totalorder %s278_s23, %s272_s21 }
  0x3c   : > { %p275_p10 = pneg %p274_p9  ;;  %p281_p3 = por %p280_p2, %p279_p12 }
  0x3e   : > { %p282_p4 = pnand %p281_p3, %p275_p10 }
  0x40   : > { %285 = shalt.err (!%p282_p4)
}
  0x41   : > { %s286_s24 = scalar_lea.hbm %s442_s19, 128  ;;  %s290_s27 = scalar_lea.hbm %s483_s1, 256 }
  0x42   : > { %p287_p7 = scmp.ne.s32.totalorder %s442_s19, %s286_s24  ;;  %p291_p13 = scmp.lt.u32.totalorder %s442_s19, %s483_s1 }
  0x43   : > { %p292_p1 = scmp.lt.u32.totalorder %s290_s27, %s286_s24  ;;  %p294_p5 = scmp.lt.u32.totalorder %s286_s24, %s442_s19 }
  0x44   : > { %p288_p8 = pnand %p287_p7, %p494_p6 }
  0x45   : > { %p293_p0 = por %p292_p1, %p291_p13 }
  0x46   : > { %p289_p11 = pneg %p288_p8 }
  0x47   : > { %p295_p9 = por %p294_p5, %p293_p0 }
  0x49   : > { %p296_p10 = pnand %p295_p9, %p289_p11 }
  0x4b   : > { %299 = shalt.err (!%p296_p10)
}
  0x4c   : > { %198 = dma.vmem_to_hbm [thread:$0]  (%p494_p6), %s437_s11, 128, %s442_s19, %s112_s20  }
  0x4d PF: > { %p210_p12 = scmp.ge.s32.totalorder %s338_s9, 2  ;;  %s137_s30 = sand.u32 1, %s326_s6  }
  0x4e   : > { %p495_p2 = scmp.ne.s32.totalorder %s488_s17, 0  ;;  %s138_s2 = scalar_lea.sflag [#allocation4], %s137_s30 }
  0x50   : > { %p205_p3 = pnand %p210_p12, %p495_p2 }
  0x52   : > { %321 = dma.done.wait (!%p205_p3), %s138_s2, 128  }
  0x53   : > { %323 = vsyncadd (!%p205_p3), %s138_s2, 4294967168  ;;  %p12_p4 = scmp.ge.s32.totalorder %s377_s12, 4   ;;  %s496_s6 = smov %s330_s7 }
  0x54   : > { %s497_s7 = smov %s334_s8  ;;  %s498_s8 = smov %s388_s15 }
  0x55   : > { %s499_s9 = smov %s377_s12  ;;  %14 = sbr.rel (!%p12_p4) target bundleno = 4 (0x4), region = 61 }
  0x5c   :  { %143 = vsyncpa [#allocation3], 1 }
  0x5d   :  { %145 = vsyncpa [#allocation3 + $0x1], 1 }
  0x5e   :  { %146 = vsyncpa [#allocation4], 1 }
  0x5f   :  { %148 = vsyncpa [#allocation4 + $0x1], 1 }

// kernel: tpu_custom_call.1
= control target key start
LH: loop header
LB: loop body
LE: loop exit
PB: predicated region body
PF: predicated region fallthrough
CT: control target
= control target key end

     0   :  { %8 = vsyncpa [#allocation3], 0  ;;  %s1123_s0 = inlined_call_operand.hbm [shape: bf16[128,36], index: 0, kind: input, shape index: {}]   ;;  %s1124_s1 = inlined_call_operand.hbm [shape: bf16[36,128], index: 1, kind: input, shape index: {}]   ;;  %s1125_s2 = inlined_call_operand.hbm [shape: f32[1,128], index: 2, kind: input, shape index: {}]   ;;  %s1126_s3 = inlined_call_operand.hbm [shape: bf16[128,128], index: 3, kind: output, shape index: {}]  }
   0x1   :  { %10 = vsyncpa [#allocation3 + $0x1], 0 }
   0x2   :  { %11 = vsyncpa [#allocation6], 0 }
   0x3   :  { %12 = vsyncpa [#allocation4], 0 }
   0x4   :  { %14 = vsyncpa [#allocation4 + $0x1], 0  ;;  %s874_s12 = smov 0   ;;  %s876_s13 = smov 0  }
   0x5   :  { %s878_s14 = smov 0   ;;  %s880_s15 = smov 0  }
   0x6 LB: > { %s895_s16 = sadd.s32 4294967295, %s844_s15   ;;  %s510_s17 = sadd.s32 4294967294, %s844_s15   ;;  %s844_s15 = sphi %s880_s15, %s1146_s15   ;;  %s840_s14 = sphi %s878_s14, %s1145_s14   ;;  %s836_s13 = sphi %s876_s13, %s1144_s13   ;;  %s832_s12 = sphi %s874_s12, %s1143_s12  }
   0x7   : > { %p40_p0 = scmp.ne.s32.totalorder %s836_s13, %s832_s12  ;;  %p1127_p1 = scmp.eq.s32.totalorder %s895_s16, 0 }
   0x8   : > { %p112_p3 = scmp.eq.s32.totalorder %s510_s17, 1  ;;  %p511_p5 = scmp.ge.s32.totalorder %s844_s15, 1 }
   0x9   : > { %p904_p4 = por %p1127_p1, %p40_p0  ;;  %p119_p7 = scmp.lt.s32.totalorder %s844_s15, 3 }
   0xa   : > { %p909_p6 = por %p112_p3, %p40_p0  ;;  %s846_s21 = smov [#allocation5]  }
   0xb   : > { %s1130_s18 = scalar_select %p904_p4, 1, 0 }
   0xc   : > { %s1131_s19 = scalar_select %p909_p6, 1, 0 }
   0xd   : > { %p914_p8 = pnand %p511_p5, %p119_p7  ;;  %s131_s22 = sshll.u32 %s846_s21, 4  ;;  %s918_s22 = int_to_ptr.vmem [resolvable:$true] %s131_s22 }
   0xe   : > { %s847_s24 = smov [#allocation7]   ;;  %s688_s28 = scalar_lea.hbm %s1124_s1, 320 }
   0xf   : > { %p622_p9 = pneg %p914_p8  ;;  %s145_s25 = sshll.u32 %s847_s24, 4  ;;  %s929_s25 = int_to_ptr.vmem [resolvable:$true] %s145_s25 }
  0x10   : > { %p689_p12 = scmp.ne.s32.totalorder %s1124_s1, %s688_s28  ;;  %p695_p5 = scmp.lt.u32.totalorder %s688_s28, %s1124_s1 }
  0x11   : > { %p925_p11 = pnand %p622_p9, %p1127_p1 }
  0x13   : > { %p690_p13 = pneg %p925_p11 }
  0x15   : > { %p691_p0 = pnand %p690_p13, %p689_p12 }
  0x17   : > { %p692_p3 = pneg %p691_p0 }
  0x19   : > { %p697_p7 = pnand %p695_p5, %p692_p3 }
  0x1b   : > { %700 = shalt.err (!%p697_p7)
}
  0x1c   : > { %s701_s6 = scalar_lea.vmem %s918_s22, 320  ;;  %p709_p2 = scmp.lt.s32.totalorder %s918_s22, %s918_s22 }
  0x1d   : > { %p702_p9 = scmp.ne.s32.totalorder %s918_s22, %s701_s6  ;;  %p710_p12 = scmp.lt.s32.totalorder %s701_s6, %s701_s6 }
  0x1f   : > { %p704_p10 = pnand %p702_p9, %p690_p13  ;;  %p711_p0 = por %p710_p12, %p709_p2 }
  0x21   : > { %p705_p1 = pneg %p704_p10 }
  0x23   : > { %p712_p6 = pnand %p711_p0, %p705_p1 }
  0x25   : > { %715 = shalt.err (!%p712_p6)
}
  0x26   : > { %s848_s7 = smov 64   ;;  %s849_s8 = smov 4  }
  0x27   : > { %625 = dma.hbm_to_vmem [thread:$0]  (!%p925_p11), %s1124_s1, 320, %s918_s22, [#allocation6], %s848_s7, %s848_s7, %s849_s8  }
  0x28   : > { %s716_s21 = scalar_lea.hbm %s1125_s2, 16 }
  0x29   : > { %p717_p1 = scmp.ne.s32.totalorder %s1125_s2, %s716_s21  ;;  %p723_p10 = scmp.lt.u32.totalorder %s716_s21, %s1125_s2 }
  0x2b   : > { %p719_p2 = pnand %p717_p1, %p690_p13 }
  0x2d   : > { %p720_p6 = pneg %p719_p2 }
  0x2f   : > { %p725_p3 = pnand %p723_p10, %p720_p6 }
  0x31   : > { %728 = shalt.err (!%p725_p3)
}
  0x32   : > { %s729_s22 = scalar_lea.vmem %s929_s25, 16  ;;  %s736_s29 = scalar_lea.vmem %s929_s25, 32 }
  0x33   : > { %p730_p5 = scmp.ne.s32.totalorder %s929_s25, %s729_s22  ;;  %p737_p12 = scmp.lt.s32.totalorder %s929_s25, %s929_s25 }
  0x34   : > { %p738_p0 = scmp.lt.s32.totalorder %s736_s29, %s729_s22 }
  0x35   : > { %p732_p7 = pnand %p730_p5, %p690_p13 }
  0x36   : > { %p739_p1 = por %p738_p0, %p737_p12 }
  0x37   : > { %p733_p9 = pneg %p732_p7 }
  0x39   : > { %p740_p2 = pnand %p739_p1, %p733_p9 }
  0x3b   : > { %743 = shalt.err (!%p740_p2)
}
  0x3c   : > { %628 = dma.hbm_to_vmem [thread:$0]  (!%p925_p11), %s1125_s2, 16, %s929_s25, [#allocation6]  }
  0x3d   : > { %s988_s5 = sadd.s32 1, %s844_s15   ;;  %s27_s23 = sadd.s32 1, %s840_s14 }
  0x3e   : > { %s24_s6 = ssub.s32 %s844_s15, %s988_s5  ;;  %p34_p13 = scmp.ne.s32.totalorder %s840_s14, %s836_s13 }
  0x3f   : > { %p25_p6 = scmp.eq.s32.totalorder %s24_s6, 0  ;;  %p35_p10 = scmp.eq.s32.totalorder %s844_s15, 0 }
  0x40   : > { %p1134_p3 = scmp.eq.s32.totalorder %s895_s16, 1  ;;  %p639_p7 = scmp.lt.s32.totalorder %s844_s15, 2 }
  0x41   : > { %s1004_s10 = scalar_select %p25_p6, %s840_s14, %s27_s23  }
  0x42   : > { %p998_p5 = por %p1134_p3, %p34_p13  ;;  %p36_p9 = por %p35_p10, %p34_p13 }
  0x43   : > { %s156_s11 = sand.u32 1, %s840_s14   ;;  %s548_s25 = sshll.u32 %s844_s15, 9 }
  0x44   : > { %s1135_s9 = scalar_select %p998_p5, 1, 0 }
  0x45   : > { %s515_s17 = sshll.u32 %s156_s11, 5  ;;  %s1011_s26 = scalar_lea.hbm %s1123_s0, %s548_s25 }
  0x46   : > { %s160_s27 = scalar_lea.vmem [#allocation2], %s515_s17  ;;  %p1015_p11 = pnand %p639_p7, %p36_p9 }
  0x47   : > { %s167_s28 = sshll.u32 %s160_s27, 4  ;;  %s1019_s29 = scalar_lea.sflag [#allocation3], %s156_s11  ;;  %s1013_s28 = int_to_ptr.vmem [resolvable:$true] %s167_s28 }
  0x48   : > { %s744_s30 = scalar_lea.hbm %s1011_s26, 512  ;;  %p746_p0 = pneg %p1015_p11 }
  0x49   : > { %p745_p12 = scmp.ne.s32.totalorder %s1011_s26, %s744_s30  ;;  %s749_s6 = scalar_lea.hbm %s1123_s0, 1024 }
  0x4a   : > { %p750_p13 = scmp.lt.u32.totalorder %s1011_s26, %s1123_s0  ;;  %p751_p6 = scmp.lt.u32.totalorder %s749_s6, %s744_s30 }
  0x4b   : > { %p747_p1 = pnand %p746_p0, %p745_p12  ;;  %p753_p3 = scmp.lt.u32.totalorder %s744_s30, %s1011_s26 }
  0x4c   : > { %p752_p10 = por %p751_p6, %p750_p13 }
  0x4d   : > { %p748_p2 = pneg %p747_p1 }
  0x4e   : > { %p754_p7 = por %p753_p3, %p752_p10 }
  0x50   : > { %p755_p9 = pnand %p754_p7, %p748_p2 }
  0x52   : > { %758 = shalt.err (!%p755_p9)
}
  0x53   : > { %s759_s11 = scalar_lea.vmem %s1013_s28, 512  ;;  %s850_s21 = smov [#allocation2]  }
  0x54   : > { %p760_p12 = scmp.ne.s32.totalorder %s1013_s28, %s759_s11  ;;  %s764_s24 = sshll.u32 %s850_s21, 4  ;;  %s765_s24 = int_to_ptr.vmem [resolvable:$false] %s764_s24 }
  0x55   : > { %s766_s27 = scalar_lea.vmem %s765_s24, 1024  ;;  %p767_p4 = scmp.lt.s32.totalorder %s1013_s28, %s765_s24 }
  0x56   : > { %p762_p1 = pnand %p760_p12, %p746_p0  ;;  %p768_p13 = scmp.lt.s32.totalorder %s766_s27, %s759_s11 }
  0x58   : > { %p763_p5 = pneg %p762_p1  ;;  %p769_p6 = por %p768_p13, %p767_p4 }
  0x5a   : > { %p770_p10 = pnand %p769_p6, %p763_p5 }
  0x5c   : > { %773 = shalt.err (!%p770_p10)
}
  0x5d   : > { %632 = dma.hbm_to_vmem [thread:$0]  (!%p1015_p11), %s1011_s26, 512, %s1013_s28, %s1019_s29, %s848_s7, %s848_s7, %s849_s8  }
  0x5e   : > { %179 = sbr.rel (%p914_p8) target bundleno = 354 (0x162), region = 32  ;;  %s1053_s30 = sand.u32 (!%p914_p8), 1, %s836_s13  }
  0x5f   : > { %s519_s4 = sshll.u32 (!%p914_p8), %s1053_s30, 5  ;;  %s182_s23 = scalar_lea.sflag (!%p914_p8), [#allocation3], %s1053_s30 }
  0x60   : > { %s185_s22 = scalar_lea.vmem (!%p914_p8), [#allocation2], %s519_s4  ;;  %p1137_p4 = scmp.ne.s32.totalorder (!%p914_p8), %s1130_s18, 0 }
  0x65   : > { %819 = dma.done.wait (%p1137_p4), %s182_s23, 512  }
  0x66   : > { %821 = vsyncadd (%p1137_p4), %s182_s23, 4294966784  ;;  %p1138_p5 = scmp.eq.s32.totalorder %s895_s16, 0 }
  0x68   : > { %823 = dma.done.wait (%p1138_p5), [#allocation6], 336   ;;  %p1139_p8 = pmov %p1138_p5 }
  0x69   : > { %v681_v0 = vld [vmem:[#allocation5] sm:$0xff]   ;;  %v682_v1 = vld [vmem:[#allocation5 + $0x8] sm:$0xff]   ;;  %vm274_vm0 = vcmask 293888   ;;  %v683_v2 = vld [vmem:[#allocation5 + $0x10] ss:$0 sps:$4 sm:$0x33]  }
  0x6a   : > { %825 = vsyncadd (%p1139_p8), [#allocation6], 4294966960  ;;  %588 = vmatprep.subr.bf16.mxu0 %v681_v0  ;;  %602 = vmatprep.subr.bf16.mxu1 %v681_v0  ;;  %v684_v3 = vld [vmem:[%s185_s22] sm:$0xff]   ;;  %v685_v4 = vld [vmem:[%s185_s22 + $0x10] sm:$0xff]   ;;  %vm287_vm1 = vcmask 1041408   ;;  %s215_s18 = scalar_lea.vmem [#allocation8], %s519_s4 }
  0x6b   : > { %589 = vmatpush3.bf16.msra.mxu0 %v681_v0  ;;  %605 = vmatpush3.bf16.msra.mxu1 %v681_v0  ;;  %v289_v5 = vsel %vm287_vm1, %v683_v2, 0  ;;  %v686_v6 = vld [vmem:[%s185_s22 + $0x8] sm:$0xff]   ;;  %v687_v7 = vld [vmem:[%s185_s22 + $0x18] sm:$0xff]   ;;  %v523_v8 = vld [vmem:[#allocation7] ss:$0 sm:$0xff]  ;;  %s418_s20 = sshll.u32 %s215_s18, 4  ;;  %s1074_s20 = int_to_ptr.vmem [resolvable:$true] %s418_s20 }
  0x6c   : > { %590 = vmatprep.subr.bf16.mxu0 %v682_v1  ;;  %603 = vmatprep.subr.bf16.mxu1 %v682_v1  ;;  %s557_s7 = sshll.u32 %s895_s16, 9  ;;  %s405_s28 = scalar_lea.sflag [#allocation4], %s1053_s30 }
  0x6d   : > { %594 = vmatprep.mubr.msk.bf16.mxu0 %vm274_vm0, %v684_v3  ;;  %598 = vmatprep.mubr.msk.bf16.mxu1 %vm274_vm0, %v685_v4  ;;  %s1079_s16 = scalar_lea.hbm %s1126_s3, %s557_s7  ;;  %s774_s29 = scalar_lea.vmem %s1074_s20, 512 }
  0x6e   : > { %p775_p11 = scmp.ne.s32.totalorder %s1074_s20, %s774_s29  ;;  %p1140_p0 = scmp.ne.s32.totalorder %s1135_s9, 0 }
  0x6f   : > { %591 = vmatpush3.bf16.msra.mxu0 %v682_v1  ;;  %606 = vmatpush3.bf16.msra.mxu1 %v682_v1  ;;  %s851_s6 = smov [#allocation8]  }
  0x70   : > { %608 = vmatprep.subr.msk.bf16.mxu0 %vm287_vm1, %v683_v2  ;;  %609 = vmatprep.subr.msk.bf16.mxu1 %vm287_vm1, %v683_v2  ;;  %p776_p2 = pnand %p775_p11, %p1140_p0  ;;  %s778_s17 = sshll.u32 %s851_s6, 4  ;;  %s779_s17 = int_to_ptr.vmem [resolvable:$false] %s778_s17 }
  0x71   : > { %s780_s25 = scalar_lea.vmem %s779_s17, 1024  ;;  %p781_p7 = scmp.lt.s32.totalorder %s1074_s20, %s779_s17 }
  0x72   : > { %p777_p3 = pneg %p776_p2  ;;  %p782_p9 = scmp.lt.s32.totalorder %s780_s25, %s774_s29 }
  0x73   : > { %593 = vmatpush3.bf16.msra.mxu0 %v289_v5  ;;  %607 = vmatpush3.bf16.msra.mxu1 %v289_v5 }
  0x74   : > { %p783_p12 = por %p782_p9, %p781_p7 }
  0x76   : > { %595 = vmatmul.mubr.msk.bf16.vlgmr.msra.gmra.mrb[0].mxu0 %vm274_vm0, %v686_v6  ;;  %599 = vmatmul.mubr.msk.bf16.vlgmr.msra.gmra.mrb[0].mxu1 %vm274_vm0, %v687_v7  ;;  %p784_p1 = pnand %p783_p12, %p777_p3 }
 0x149   : > { %v596_v9 = vpop.f32.mrb[0].mxu0  ;;  %v600_v10 = vpop.f32.mrb[0].mxu1 }
 0x14a   : > { %v334_v11 = vadd.f32 %v596_v9, %v523_v8  ;;  %v350_v12 = vadd.f32 %v600_v10, %v523_v8  ;;  %v325_v13 = vpop.f32.mrb[1].mxu0  ;;  %v341_v14 = vpop.f32.mrb[1].mxu1 }
 0x14b   : > { %v326_v15 = vadd.f32 %v523_v8, %v325_v13  ;;  %v342_v16 = vadd.f32 %v523_v8, %v341_v14  ;;  %v597_v17 = vpop.f32.mrb[2].mxu0  ;;  %v601_v18 = vpop.f32.mrb[2].mxu1 }
 0x14c   : > { %v337_v19 = vadd.f32 %v597_v17, %v523_v8  ;;  %v353_v20 = vadd.f32 %v601_v18, %v523_v8  ;;  %v328_v21 = vpop.f32.mrb[3].mxu0  ;;  %v344_v22 = vpop.f32.mrb[3].mxu1  ;;  %v358_v25 = vmax.f32 %v334_v11, 0.0  ;;  %v362_v26 = vmax.f32 %v350_v12, 0.0 }
 0x14d   : > { %v329_v23 = vadd.f32 %v523_v8, %v328_v21  ;;  %v345_v24 = vadd.f32 %v523_v8, %v344_v22  ;;  %v356_v29 = vmax.f32 %v326_v15, 0.0  ;;  %v360_v30 = vmax.f32 %v342_v16, 0.0 }
 0x14e   : > { %v359_v27 = vmax.f32 %v337_v19, 0.0  ;;  %v363_v28 = vmax.f32 %v353_v20, 0.0 }
 0x14f   : > { %v357_v31 = vmax.f32 %v329_v23, 0.0  ;;  %v361_v32 = vmax.f32 %v345_v24, 0.0 }
 0x150   : > { %v566_v33 = vpack.c.bf16 %v359_v27, %v358_v25  ;;  %v576_v34 = vpack.c.bf16 %v363_v28, %v362_v26 }
 0x151   : > { %v561_v35 = vpack.c.bf16 %v357_v31, %v356_v29  ;;  %v571_v36 = vpack.c.bf16 %v361_v32, %v360_v30 }
 0x152   : > { %578 = vst [vmem:[%s215_s18 + $0x8] sm:$0xff] %v566_v33   ;;  %580 = vst [vmem:[%s215_s18 + $0x18] sm:$0xff] %v576_v34  }
 0x153   : > { %562 = vst [vmem:[%s215_s18] sm:$0xff] %v561_v35   ;;  %579 = vst [vmem:[%s215_s18 + $0x10] sm:$0xff] %v571_v36  }
 0x154   : > { %787 = shalt.err (!%p784_p1)
}
 0x155   : > { %s788_s11 = scalar_lea.hbm %s1079_s16, 512  ;;  %s792_s27 = scalar_lea.hbm %s1126_s3, 1024 }
 0x156   : > { %p789_p13 = scmp.ne.s32.totalorder %s1079_s16, %s788_s11  ;;  %p793_p4 = scmp.lt.u32.totalorder %s1079_s16, %s1126_s3 }
 0x157   : > { %p794_p5 = scmp.lt.u32.totalorder %s792_s27, %s788_s11  ;;  %p796_p11 = scmp.lt.u32.totalorder %s788_s11, %s1079_s16 }
 0x158   : > { %p790_p6 = pnand %p789_p13, %p1140_p0 }
 0x159   : > { %p795_p8 = por %p794_p5, %p793_p4 }
 0x15a   : > { %p791_p10 = pneg %p790_p6 }
 0x15b   : > { %p797_p2 = por %p796_p11, %p795_p8 }
 0x15d   : > { %p798_p3 = pnand %p797_p2, %p791_p10 }
 0x15f   : > { %801 = shalt.err (!%p798_p3)
}
 0x160   : > { %s852_s22 = smov 64   ;;  %s853_s18 = smov 4  }
 0x161   : > { %620 = dma.vmem_to_hbm [thread:$0]  (%p1140_p0), %s1074_s20, 512, %s1079_s16, %s405_s28, %s852_s22, %s852_s22, %s853_s18  }
 0x162 PF: > { %s433_s7 = sand.u32 1, %s832_s12   ;;  %p1141_p7 = scmp.ne.s32.totalorder %s1131_s19, 0 }
 0x163   : > { %p1142_p9 = scmp.ge.s32.totalorder %s844_s15, 2  ;;  %s434_s8 = scalar_lea.sflag [#allocation4], %s433_s7 }
 0x165   : > { %p634_p12 = pnand %p1142_p9, %p1141_p7 }
 0x167   : > { %827 = dma.done.wait (!%p634_p12), %s434_s8, 512  }
 0x168   : > { %829 = vsyncadd (!%p634_p12), %s434_s8, 4294966784  ;;  %p17_p1 = scmp.ge.s32.totalorder %s988_s5, 4   ;;  %s1143_s12 = smov %s836_s13 }
 0x169   : > { %s1144_s13 = smov %s840_s14  ;;  %s1145_s14 = smov %s1004_s10 }
 0x16a   : > { %s1146_s15 = smov %s988_s5  ;;  %19 = sbr.rel (!%p17_p1) target bundleno = 6 (0x6), region = 85 }
 0x171   :  { %439 = vsyncpa [#allocation3], 1 }
 0x172   :  { %441 = vsyncpa [#allocation3 + $0x1], 1 }
 0x173   :  { %442 = vsyncpa [#allocation6], 1 }
 0x174   :  { %443 = vsyncpa [#allocation4], 1 }
 0x175   :  { %445 = vsyncpa [#allocation4 + $0x1], 1 }

</bundles_post_ra>
